<compile_context>
chip_gen: v7x
topology: tpu7x:2x2x1
jax: 0.10.0
libtpu: 0.0.40
codegen_flags: <defaults>
</compile_context>

<pallas_src>
import functools
import math

import jax
import jax.numpy as jnp
from jax.experimental import pallas as pl
from jax.experimental.pallas import tpu as pltpu


def channel_attention_kernel(x_ref, w1t_ref, w2t_ref, out_ref,
                             sum_acc, max_acc, *,
                             inv_spatial, valid_spatial, s_tile, masked):
    # x_ref   : (Bt, C, s_tile)   input dtype (spatial already padded to 128k)
    # w1t_ref : (C, hid)          transposed 1x1-conv weight 1
    # w2t_ref : (hid, C)          transposed 1x1-conv weight 2
    # out_ref : (Bt, C)
    # sum_acc : (Bt, C, 128) f32  lane-resident running sum
    # max_acc : (Bt, C, 128) f32  lane-resident running max
    s = pl.program_id(1)
    n_slabs = s_tile // 128

    @pl.when(s == 0)
    def _init():
        sum_acc[...] = jnp.zeros_like(sum_acc)
        max_acc[...] = jnp.full_like(max_acc, -jnp.inf)

    def accumulate(off, apply_mask):
        # One 128-lane slab; pure VPU add/maximum into the VMEM accumulators.
        x = x_ref[:, :, pl.ds(off, 128)].astype(jnp.float32)  # (Bt, C, 128)
        sum_acc[...] += x                     # zero padding is a no-op for sum
        if apply_mask:
            lane = jax.lax.broadcasted_iota(jnp.int32, x.shape, dimension=2)
            gidx = s * s_tile + off + lane
            x = jnp.where(gidx < valid_spatial, x, -jnp.inf)
        max_acc[...] = jnp.maximum(max_acc[...], x)

    if n_slabs <= 16:
        # Fully unrolled static slab loop; live vreg state is just one slab
        # (accumulators stay in VMEM scratch).  Only the final slab can touch
        # spatial padding, so only it is masked.
        for j in range(n_slabs):
            accumulate(j * 128, masked and (j == n_slabs - 1))
    else:
        def body(j, carry):
            accumulate(pl.multiple_of(j * 128, 128), masked)
            return carry
        jax.lax.fori_loop(0, n_slabs, body, None)

    @pl.when(s == pl.num_programs(1) - 1)
    def _finalize():
        # Single cross-lane (XLU) reduce per output, once per batch block.
        avg = jnp.sum(sum_acc[...], axis=-1) * jnp.float32(inv_spatial)  # (Bt, C)
        mx = jnp.max(max_acc[...], axis=-1)                              # (Bt, C)
        w1t = w1t_ref[...].astype(jnp.float32)                           # (C, hid)
        w2t = w2t_ref[...].astype(jnp.float32)                           # (hid, C)

        def mlp(v):
            h = jnp.maximum(
                jnp.dot(v, w1t, preferred_element_type=jnp.float32), 0.0)
            return jnp.dot(h, w2t, preferred_element_type=jnp.float32)

        out_ref[...] = jax.nn.sigmoid(mlp(avg) + mlp(mx)).astype(out_ref.dtype)


def _divisors(n):
    return [d for d in range(1, n + 1) if n % d == 0]


def _pick_b_tile(B, C, itemsize, target_block_bytes):
    """Batch tile: any divisor of B.  Prefer >= 2 batch blocks (both v7x
    TensorCores get 'parallel' work) while keeping one 128-lane slab of the
    block within the byte budget."""
    slab_bytes = C * 128 * itemsize
    max_bt = max(1, target_block_bytes // slab_bytes)
    best = 1
    for d in _divisors(B):
        if d > max_bt:
            continue
        if B >= 2 and B // d < 2:
            continue  # keep at least 2 parallel batch blocks when possible
        best = max(best, d)
    return best


def _pick_s_tile(S_pad, b_tile, C, itemsize, target_block_bytes):
    """Largest multiple-of-128 divisor of S_pad keeping the x block within
    the byte target (minimum one 128-lane slab)."""
    row_bytes = b_tile * C * itemsize
    max_lanes = max(128, (target_block_bytes // row_bytes) // 128 * 128)
    best = 128
    t = 128
    limit = min(S_pad, max_lanes)
    while t <= limit:
        if S_pad % t == 0:
            best = t
        t += 128
    return best


def channel_attention(x, w1, w2, *, s_tile=None, b_tile=None,
                      target_block_bytes=None):
    """x: (B, C, H, W) NCHW.  w1: (C//ratio, C).  w2: (C, C//ratio)."""
    B, C, H, W = x.shape
    hid = w1.shape[0]
    S = H * W
    S_pad = -(-S // 128) * 128  # round spatial up to a multiple of 128 lanes

    x_flat = x.reshape(B, C, S)
    if S_pad != S:
        # Zero padding is exact for the sum; the max path masks padded lanes
        # with -inf inside the kernel.
        x_flat = jnp.pad(x_flat, ((0, 0), (0, 0), (0, S_pad - S)))

    itemsize = jnp.dtype(x.dtype).itemsize

    # Per-generation VMEM capacity (v5e/v6e: 128 MiB, v7x: 64 MiB/TC).
    try:
        vmem_cap = int(pltpu.get_tpu_info().vmem_capacity_bytes)
    except Exception:  # conservative fallback (v7x per-core VMEM)
        vmem_cap = 64 * 1024 * 1024

    if target_block_bytes is None:
        # Bigger streaming blocks on 128-MiB-VMEM chips (v5e/v6e).
        target_block_bytes = (4 << 20) if vmem_cap >= (100 << 20) else (2 << 20)

    if b_tile is None:
        b_tile = _pick_b_tile(B, C, itemsize, target_block_bytes)
    assert B % b_tile == 0, "b_tile must divide B"
    if s_tile is None:
        s_tile = _pick_s_tile(S_pad, b_tile, C, itemsize, target_block_bytes)
    assert S_pad % s_tile == 0 and s_tile % 128 == 0, "bad s_tile"

    n_b = B // b_tile
    n_s = S_pad // s_tile

    # Expose batch blocks as a leading (squeezed) dim so every block's last
    # two dims equal the full array dims -> any b_tile is layout-legal, and
    # B >= 2 always yields >= 2 'parallel' batch blocks for v7x megacore.
    x_blk = x_flat.reshape(n_b, b_tile, C, S_pad)

    # Pre-transpose 1x1-conv weights once so the epilogue has no transposes.
    w1t = jnp.asarray(w1).T  # (C, hid)
    w2t = jnp.asarray(w2).T  # (hid, C)

    # Scoped-VMEM budget: double-buffered x block + weights + f32 accumulators
    # + output + headroom, capped at 75% of this chip's physical VMEM.
    x_block_bytes = b_tile * C * s_tile * itemsize
    acc_bytes = 2 * b_tile * C * 128 * 4
    w_bytes = 2 * (C * hid) * jnp.dtype(w1t.dtype).itemsize
    out_bytes = 2 * b_tile * C * itemsize
    budget = 2 * x_block_bytes + acc_bytes + w_bytes + out_bytes + (2 << 20)
    vmem_limit = int(min(max(budget, 16 * 1024 * 1024), int(0.75 * vmem_cap)))

    kernel = functools.partial(
        channel_attention_kernel,
        inv_spatial=1.0 / S,
        valid_spatial=S,
        s_tile=s_tile,
        masked=(S_pad != S),
    )

    out = pl.pallas_call(
        kernel,
        out_shape=jax.ShapeDtypeStruct((n_b, b_tile, C), x.dtype),
        grid=(n_b, n_s),
        in_specs=[
            pl.BlockSpec((None, b_tile, C, s_tile), lambda b, s: (b, 0, 0, s)),
            pl.BlockSpec((C, hid), lambda b, s: (0, 0)),
            pl.BlockSpec((hid, C), lambda b, s: (0, 0)),
        ],
        out_specs=pl.BlockSpec((None, b_tile, C), lambda b, s: (b, 0, 0)),
        scratch_shapes=[
            pltpu.VMEM((b_tile, C, 128), jnp.float32),  # lane-resident sum
            pltpu.VMEM((b_tile, C, 128), jnp.float32),  # lane-resident max
        ],
        compiler_params=pltpu.CompilerParams(
            dimension_semantics=("parallel", "arbitrary"),
            vmem_limit_bytes=vmem_limit,
        ),
    )(x_blk, w1t, w2t)

    return out.reshape(B, C, 1, 1)


def reference(x, w1, w2):
    # Pure-JAX reference mirroring the PyTorch forward.
    avg = jnp.mean(x, axis=(2, 3))
    mx = jnp.max(x, axis=(2, 3))

    def mlp(v):
        return jnp.maximum(v @ w1.T, 0.0) @ w2.T

    return jax.nn.sigmoid(mlp(avg) + mlp(mx)).reshape(x.shape[0], x.shape[1], 1, 1)


if __name__ == "__main__":
    B, C, H, W = 2, 32, 16, 16
    ratio = 16
    hid = C // ratio  # = 2

    key = jax.random.PRNGKey(0)
    kx, k1, k2 = jax.random.split(key, 3)

    x = jax.random.normal(kx, (B, C, H, W), dtype=jnp.float32)

    # Deterministic init (kaiming-uniform-like), bias=False as in the module.
    bound1 = 1.0 / math.sqrt(C)
    bound2 = 1.0 / math.sqrt(hid)
    w1 = jax.random.uniform(k1, (hid, C), jnp.float32, -bound1, bound1)
    w2 = jax.random.uniform(k2, (C, hid), jnp.float32, -bound2, bound2)

    # Exercise the multi-step pipelined reduction (S=256 -> 2 spatial steps)
    # with 2 parallel batch blocks (b_tile=1, v7x both-core path).
    out = channel_attention(x, w1, w2, s_tile=128, b_tile=1)
    out = jax.block_until_ready(out)
    ref = reference(x, w1, w2)
    assert out.shape == (B, C, 1, 1)
    assert jnp.allclose(out, ref, atol=1e-5, rtol=1e-5), "mismatch vs reference"

    # Exercise the ragged-spatial path (S = 10*10 = 100 -> padded to 128;
    # padded lanes masked with -inf in the max path).
    x2 = jax.random.normal(jax.random.PRNGKey(1), (B, C, 10, 10), jnp.float32)
    out2 = jax.block_until_ready(channel_attention(x2, w1, w2))
    ref2 = reference(x2, w1, w2)
    assert jnp.allclose(out2, ref2, atol=1e-5, rtol=1e-5), "ragged mismatch"

    print("KERNEL_OK")
</pallas_src>

<mosaic_0001>
module attributes {stable_mosaic.version = 11 : i64} {
  func.func @channel_attention_kernel(%arg0: i32, %arg1: i32, %arg2: memref<1x1x32x128xf32, #tpu.memory_space<vmem>>, %arg3: memref<32x2xf32, #tpu.memory_space<vmem>>, %arg4: memref<2x32xf32, #tpu.memory_space<vmem>>, %arg5: memref<1x1x32xf32, #tpu.memory_space<vmem>>, %arg6: memref<1x32x128xf32, #tpu.memory_space<vmem>>, %arg7: memref<1x32x128xf32, #tpu.memory_space<vmem>>) attributes {dimension_semantics = [#tpu.dimension_semantics<parallel>, #tpu.dimension_semantics<arbitrary>], iteration_bounds = array<i64: 2, 2>, scalar_prefetch = 0 : i64, scratch_operands = 2 : i64, tpu.core_type = #tpu.core_type<tc>, window_params = [{transform_indices = @transform_0, window_bounds = array<i64: 1, 1, 32, 128>}, {pipeline_mode = #tpu.pipeline_mode<synchronous>, transform_indices = @transform_1, window_bounds = array<i64: 32, 2>}, {pipeline_mode = #tpu.pipeline_mode<synchronous>, transform_indices = @transform_2, window_bounds = array<i64: 2, 32>}, {transform_indices = @transform_3, window_bounds = array<i64: 1, 1, 32>}]} {
    %c0_i32 = arith.constant 0 : i32
    %0 = arith.cmpi eq, %arg1, %c0_i32 : i32
    %1 = arith.extui %0 : i1 to i32
    %c0_i32_0 = arith.constant 0 : i32
    %2 = arith.cmpi ne, %1, %c0_i32_0 : i32
    scf.if %2 {
      %cst = arith.constant 0.000000e+00 : f32
      %14 = vector.broadcast %cst : f32 to vector<1x32x128xf32>
      %c0_17 = arith.constant 0 : index
      %c0_18 = arith.constant 0 : index
      %c0_19 = arith.constant 0 : index
      %15 = vector.load %arg6[%c0_17, %c0_18, %c0_19] : memref<1x32x128xf32, #tpu.memory_space<vmem>>, vector<1x32x128xf32>
      tpu.vector_store %arg6[%c0_17, %c0_18, %c0_19], %14 {strides = array<i32>} : memref<1x32x128xf32, #tpu.memory_space<vmem>>, vector<1x32x128xf32>,
      %cst_20 = arith.constant 0xFF800000 : f32
      %16 = vector.broadcast %cst_20 : f32 to vector<1x32x128xf32>
      %c0_21 = arith.constant 0 : index
      %c0_22 = arith.constant 0 : index
      %c0_23 = arith.constant 0 : index
      %17 = vector.load %arg7[%c0_21, %c0_22, %c0_23] : memref<1x32x128xf32, #tpu.memory_space<vmem>>, vector<1x32x128xf32>
      tpu.vector_store %arg7[%c0_21, %c0_22, %c0_23], %16 {strides = array<i32>} : memref<1x32x128xf32, #tpu.memory_space<vmem>>, vector<1x32x128xf32>,
    } else {
    }
    %c0 = arith.constant 0 : index
    %c0_1 = arith.constant 0 : index
    %c0_2 = arith.constant 0 : index
    %c0_3 = arith.constant 0 : index
    %3 = vector.load %arg2[%c0, %c0_1, %c0_2, %c0_3] : memref<1x1x32x128xf32, #tpu.memory_space<vmem>>, vector<1x1x32x128xf32>
    %4 = vector.shape_cast %3 : vector<1x1x32x128xf32> to vector<1x32x128xf32>
    %c0_4 = arith.constant 0 : index
    %c0_5 = arith.constant 0 : index
    %c0_6 = arith.constant 0 : index
    %5 = vector.load %arg6[%c0_4, %c0_5, %c0_6] : memref<1x32x128xf32, #tpu.memory_space<vmem>>, vector<1x32x128xf32>
    %6 = arith.addf %5, %4 : vector<1x32x128xf32>
    %c0_7 = arith.constant 0 : index
    %c0_8 = arith.constant 0 : index
    %c0_9 = arith.constant 0 : index
    %7 = vector.load %arg6[%c0_7, %c0_8, %c0_9] : memref<1x32x128xf32, #tpu.memory_space<vmem>>, vector<1x32x128xf32>
    tpu.vector_store %arg6[%c0_7, %c0_8, %c0_9], %6 {strides = array<i32>} : memref<1x32x128xf32, #tpu.memory_space<vmem>>, vector<1x32x128xf32>,
    %c0_10 = arith.constant 0 : index
    %c0_11 = arith.constant 0 : index
    %c0_12 = arith.constant 0 : index
    %8 = vector.load %arg7[%c0_10, %c0_11, %c0_12] : memref<1x32x128xf32, #tpu.memory_space<vmem>>, vector<1x32x128xf32>
    %9 = arith.maximumf %8, %4 : vector<1x32x128xf32>
    %c0_13 = arith.constant 0 : index
    %c0_14 = arith.constant 0 : index
    %c0_15 = arith.constant 0 : index
    %10 = vector.load %arg7[%c0_13, %c0_14, %c0_15] : memref<1x32x128xf32, #tpu.memory_space<vmem>>, vector<1x32x128xf32>
    tpu.vector_store %arg7[%c0_13, %c0_14, %c0_15], %9 {strides = array<i32>} : memref<1x32x128xf32, #tpu.memory_space<vmem>>, vector<1x32x128xf32>,
    %c1_i32 = arith.constant 1 : i32
    %11 = arith.cmpi eq, %arg1, %c1_i32 : i32
    %12 = arith.extui %11 : i1 to i32
    %c0_i32_16 = arith.constant 0 : i32
    %13 = arith.cmpi ne, %12, %c0_i32_16 : i32
    scf.if %13 {
      %c0_17 = arith.constant 0 : index
      %c0_18 = arith.constant 0 : index
      %c0_19 = arith.constant 0 : index
      %14 = vector.load %arg6[%c0_17, %c0_18, %c0_19] : memref<1x32x128xf32, #tpu.memory_space<vmem>>, vector<1x32x128xf32>
      %cst = arith.constant dense<0.000000e+00> : vector<1x32xf32>
      %15 = vector.multi_reduction <add>, %14, %cst [2] : vector<1x32x128xf32> to vector<1x32xf32>
      %cst_20 = arith.constant 3.906250e-03 : f32
      %16 = vector.broadcast %cst_20 : f32 to vector<1x32xf32>
      %17 = arith.mulf %15, %16 : vector<1x32xf32>
      %c0_21 = arith.constant 0 : index
      %c0_22 = arith.constant 0 : index
      %c0_23 = arith.constant 0 : index
      %18 = vector.load %arg7[%c0_21, %c0_22, %c0_23] : memref<1x32x128xf32, #tpu.memory_space<vmem>>, vector<1x32x128xf32>
      %cst_24 = arith.constant dense<0xFF800000> : vector<1x32xf32>
      %19 = vector.multi_reduction <maximumf>, %18, %cst_24 [2] : vector<1x32x128xf32> to vector<1x32xf32>
      %c0_25 = arith.constant 0 : index
      %c0_26 = arith.constant 0 : index
      %20 = vector.load %arg3[%c0_25, %c0_26] : memref<32x2xf32, #tpu.memory_space<vmem>>, vector<32x2xf32>
      %c0_27 = arith.constant 0 : index
      %c0_28 = arith.constant 0 : index
      %21 = vector.load %arg4[%c0_27, %c0_28] : memref<2x32xf32, #tpu.memory_space<vmem>>, vector<2x32xf32>
      %cst_29 = arith.constant dense<0.000000e+00> : vector<1x2xf32>
      %22 = tpu.matmul %17, %20, %cst_29 {dimension_numbers = #tpu.dot_dimension_numbers<[1], [0], [0], [1], [0, 0, 1, 1], [], []>} : vector<1x32xf32>, vector<32x2xf32>, vector<1x2xf32> -> vector<1x2xf32>
      %cst_30 = arith.constant 0.000000e+00 : f32
      %23 = vector.broadcast %cst_30 : f32 to vector<1x2xf32>
      %24 = arith.maximumf %22, %23 : vector<1x2xf32>
      %cst_31 = arith.constant dense<0.000000e+00> : vector<1x32xf32>
      %25 = tpu.matmul %24, %21, %cst_31 {dimension_numbers = #tpu.dot_dimension_numbers<[1], [0], [0], [1], [0, 0, 1, 1], [], []>} : vector<1x2xf32>, vector<2x32xf32>, vector<1x32xf32> -> vector<1x32xf32>
      %cst_32 = arith.constant dense<0.000000e+00> : vector<1x2xf32>
      %26 = tpu.matmul %19, %20, %cst_32 {dimension_numbers = #tpu.dot_dimension_numbers<[1], [0], [0], [1], [0, 0, 1, 1], [], []>} : vector<1x32xf32>, vector<32x2xf32>, vector<1x2xf32> -> vector<1x2xf32>
      %cst_33 = arith.constant 0.000000e+00 : f32
      %27 = vector.broadcast %cst_33 : f32 to vector<1x2xf32>
      %28 = arith.maximumf %26, %27 : vector<1x2xf32>
      %cst_34 = arith.constant dense<0.000000e+00> : vector<1x32xf32>
      %29 = tpu.matmul %28, %21, %cst_34 {dimension_numbers = #tpu.dot_dimension_numbers<[1], [0], [0], [1], [0, 0, 1, 1], [], []>} : vector<1x2xf32>, vector<2x32xf32>, vector<1x32xf32> -> vector<1x32xf32>
      %30 = arith.addf %25, %29 : vector<1x32xf32>
      %31 = arith.negf %30 : vector<1x32xf32>
      %32 = math.exp %31 : vector<1x32xf32>
      %cst_35 = arith.constant 1.000000e+00 : f32
      %33 = vector.broadcast %cst_35 : f32 to vector<1x32xf32>
      %34 = arith.addf %33, %32 : vector<1x32xf32>
      %35 = arith.divf %33, %34 : vector<1x32xf32>
      %c0_36 = arith.constant 0 : index
      %c0_37 = arith.constant 0 : index
      %c0_38 = arith.constant 0 : index
      %36 = vector.load %arg5[%c0_36, %c0_37, %c0_38] : memref<1x1x32xf32, #tpu.memory_space<vmem>>, vector<1x1x32xf32>
      %37 = vector.shape_cast %36 : vector<1x1x32xf32> to vector<1x32xf32>
      %38 = vector.shape_cast %35 : vector<1x32xf32> to vector<1x1x32xf32>
      tpu.vector_store %arg5[%c0_36, %c0_37, %c0_38], %38 {strides = array<i32>} : memref<1x1x32xf32, #tpu.memory_space<vmem>>, vector<1x1x32xf32>,
    } else {
    }
    return
  }
  func.func @transform_0(%arg0: i32, %arg1: i32) -> (i32, i32, i32, i32) {
    %c0_i32 = arith.constant 0 : i32
    %c0_i32_0 = arith.constant 0 : i32
    %c0_i32_1 = arith.constant 0 : i32
    return %arg0, %c0_i32, %c0_i32_0, %arg1 : i32, i32, i32, i32
  }
  func.func @transform_1(%arg0: i32, %arg1: i32) -> (i32, i32) {
    %c0_i32 = arith.constant 0 : i32
    %c0_i32_0 = arith.constant 0 : i32
    %c0_i32_1 = arith.constant 0 : i32
    return %c0_i32, %c0_i32_0 : i32, i32
  }
  func.func @transform_2(%arg0: i32, %arg1: i32) -> (i32, i32) {
    %c0_i32 = arith.constant 0 : i32
    %c0_i32_0 = arith.constant 0 : i32
    %c0_i32_1 = arith.constant 0 : i32
    return %c0_i32, %c0_i32_0 : i32, i32
  }
  func.func @transform_3(%arg0: i32, %arg1: i32) -> (i32, i32, i32) {
    %c0_i32 = arith.constant 0 : i32
    %c0_i32_0 = arith.constant 0 : i32
    %c0_i32_1 = arith.constant 0 : i32
    return %arg0, %c0_i32, %c0_i32_0 : i32, i32, i32
  }
}

</mosaic_0001>

<bundles_post_ra>
// kernel: tpu_custom_call.1
= control target key start
LH: loop header
LB: loop body
LE: loop exit
PB: predicated region body
PF: predicated region fallthrough
CT: control target
= control target key end

     0   :  { %8 = vsyncpa [#allocation5], 0  ;;  %s1354_s0 = inlined_call_operand.hbm [shape: f32[2,1,32,256], index: 0, kind: input, shape index: {}]   ;;  %s1355_s1 = inlined_call_operand.vmem [shape: f32[32,2], index: 1, kind: input, shape index: {}]   ;;  %s1356_s2 = inlined_call_operand.vmem [shape: f32[2,32], index: 2, kind: input, shape index: {}]   ;;  %s1357_s3 = inlined_call_operand.hbm [shape: f32[2,1,32], index: 3, kind: output, shape index: {}]  }
   0x1   :  { %10 = vsyncpa [#allocation5 + $0x1], 0 }
   0x2   :  { %11 = vsyncpa [#allocation6], 0 }
   0x3   :  { %13 = vsyncpa [#allocation6 + $0x1], 0  ;;  %s1110_s12 = smov 0   ;;  %s1112_s13 = smov 0  }
   0x4   :  { %s1114_s14 = smov 0   ;;  %s1116_s15 = smov 0  }
   0x5   :  { %s1118_s16 = smov 0   ;;  %s1120_s17 = smov 0  }
   0x6   :  { %s1122_s18 = smov 0   ;;  %s1124_s19 = smov 0  }
   0x7   :  { %s1126_s20 = smov 0   ;;  %s1128_s21 = smov 0  }
   0x8   :  { %s1130_s22 = smov 0  }
   0x9 LB: > { %s732_s23 = sadd.s32 4294967295, %s1078_s22   ;;  %s733_s24 = sadd.s32 4294967294, %s1078_s22   ;;  %s1078_s22 = sphi %s1130_s22, %s19_s22   ;;  %s1074_s21 = sphi %s1128_s21, %s1381_s21   ;;  %s1070_s20 = sphi %s1126_s20, %s1380_s20   ;;  %s1066_s19 = sphi %s1124_s19, %s1379_s19   ;;  %s1062_s18 = sphi %s1122_s18, %s1378_s18   ;;  %s1058_s17 = sphi %s1120_s17, %s1377_s17   ;;  %s1054_s16 = sphi %s1118_s16, %s1376_s16   ;;  %s1050_s15 = sphi %s1116_s15, %s1375_s15   ;;  %s1046_s14 = sphi %s1114_s14, %s1374_s14   ;;  %s1042_s13 = sphi %s1112_s13, %s1373_s13   ;;  %s1038_s12 = sphi %s1110_s12, %s1372_s12  }
   0xa   : > { %s28_s25 = sadd.s32 1, %s1070_s20  ;;  %s31_s26 = sadd.s32 1, %s1074_s21 }
   0xb   : > { %p29_p0 = scmp.ge.s32.totalorder %s28_s25, 2  ;;  %s40_s27 = sadd.s32 1, %s1058_s17 }
   0xc   : > { %p47_p1 = scmp.ne.s32.totalorder %s1058_s17, %s1054_s16  ;;  %p48_p2 = scmp.eq.s32.totalorder %s1078_s22, 0 }
   0xd   : > { %s1383_s25 = smov (%p29_p0, %s28_s25), 0  ;;  %s1385_s26 = smov (!%p29_p0, %s31_s26), %s1074_s21 }
   0xe   : > { %1361 = sst [smem:[#allocation10_spill]] %s1383_s25  ;;  %s36_s28 = ssub.s32 %s1070_s20, %s1383_s25 }
   0xf   : > { %p1176_p3 = por %p48_p2, %p47_p1  ;;  %p33_p4 = scmp.ge.s32.totalorder %s1385_s26, 2 }
  0x10   : > { %p53_p5 = scmp.ne.s32.totalorder %s1054_s16, %s1050_s15  ;;  %p54_p6 = scmp.eq.s32.totalorder %s732_s23, 0 }
  0x11   : > { %s108_s30 = sadd.s32 1, %s1046_s14  ;;  %s1387_s26 = smov (%p33_p4, %s1385_s26), 0 }
  0x12   : > { %1363 = sst [smem:[#allocation11_spill]] %s1387_s26  ;;  %p1184_p7 = por %p54_p6, %p53_p5 }
  0x13   : > { %p118_p8 = scmp.ne.s32.totalorder %s1046_s14, %s1042_s13  ;;  %s35_s5 = ssub.s32 %s1074_s21, %s1387_s26 }
  0x14   : > { %p119_p9 = scmp.eq.s32.totalorder %s732_s23, 3  ;;  %s37_s6 = sor.u32 %s36_s28, %s35_s5 }
  0x15   : > { %p106_p10 = scmp.eq.s32.totalorder %s35_s5, 0  ;;  %p38_p11 = scmp.eq.s32.totalorder %s37_s6, 0 }
  0x16   : > { %p1192_p12 = por %p119_p9, %p118_p8  ;;  %p124_p13 = scmp.ne.s32.totalorder %s1042_s13, %s1038_s12 }
  0x17   : > { %s1197_s8 = scalar_select %p106_p10, %s1046_s14, %s108_s30  }
  0x18   : > { %s1365_s7 = scalar_select %p1192_p12, 1, 0 }
  0x19   : > { %s1200_s9 = scalar_select %p38_p11, %s1058_s17, %s40_s27  }
  0x1a   : > { %p125_p0 = scmp.eq.s32.totalorder %s733_s24, 3  ;;  %p824_p1 = scmp.lt.s32.totalorder %s1078_s22, 4 }
  0x1b   : > { %s151_s11 = sand.u32 1, %s1058_s17   ;;  %s737_s23 = sshll.u32 %s1074_s21, 3 }
  0x1c   : > { %p1205_p2 = por %p125_p0, %p124_p13  ;;  %s736_s15 = sshll.u32 %s151_s11, 5 }
  0x1d   : > { %s160_s28 = sadd.s32 %s1070_s20, %s737_s23  ;;  %s155_s5 = scalar_lea.vmem [#allocation4], %s736_s15 }
  0x1e   : > { %s1366_s10 = scalar_select %p1205_p2, 1, 0 }
  0x1f   : > { %s163_s6 = sshll.u32 %s155_s5, 4  ;;  %s738_s26 = sshll.u32 %s160_s28, 7  ;;  %s1212_s6 = int_to_ptr.vmem [resolvable:$true] %s163_s6 }
  0x20   : > { %s1217_s27 = scalar_lea.hbm %s1354_s0, %s738_s26  ;;  %p1221_p4 = pnand %p824_p1, %p1176_p3 }
  0x21   : > { %s1225_s15 = scalar_lea.sflag [#allocation5], %s151_s11  ;;  %s926_s23 = scalar_lea.hbm %s1217_s27, 512 }
  0x22   : > { %p927_p5 = scmp.ne.s32.totalorder %s1217_s27, %s926_s23  ;;  %p928_p6 = pneg %p1221_p4 }
  0x23   : > { %s931_s29 = scalar_lea.hbm %s1354_s0, 2048  ;;  %p932_p3 = scmp.lt.u32.totalorder %s1217_s27, %s1354_s0 }
  0x24   : > { %p929_p8 = pnand %p928_p6, %p927_p5  ;;  %p933_p10 = scmp.lt.u32.totalorder %s931_s29, %s926_s23 }
  0x25   : > { %p935_p13 = scmp.lt.u32.totalorder %s926_s23, %s1217_s27 }
  0x26   : > { %p930_p9 = pneg %p929_p8  ;;  %p934_p11 = por %p933_p10, %p932_p3 }
  0x28   : > { %p936_p0 = por %p935_p13, %p934_p11 }
  0x2a   : > { %p937_p1 = pnand %p936_p0, %p930_p9 }
  0x2c   : > { %940 = shalt.err (!%p937_p1)
}
  0x2d   : > { %s941_s11 = scalar_lea.vmem %s1212_s6, 512  ;;  %s1080_s30 = smov [#allocation4]  }
  0x2e   : > { %p942_p5 = scmp.ne.s32.totalorder %s1212_s6, %s941_s11  ;;  %s946_s25 = sshll.u32 %s1080_s30, 4  ;;  %s947_s25 = int_to_ptr.vmem [resolvable:$false] %s946_s25 }
  0x2f   : > { %s948_s26 = scalar_lea.vmem %s947_s25, 1024  ;;  %p949_p12 = scmp.lt.s32.totalorder %s1212_s6, %s947_s25 }
  0x30   : > { %p944_p8 = pnand %p942_p5, %p928_p6  ;;  %p950_p3 = scmp.lt.s32.totalorder %s948_s26, %s941_s11 }
  0x32   : > { %p945_p2 = pneg %p944_p8  ;;  %p951_p10 = por %p950_p3, %p949_p12 }
  0x34   : > { %p952_p11 = pnand %p951_p10, %p945_p2 }
  0x36   : > { %955 = shalt.err (!%p952_p11)
}
  0x37   : > { %s1081_s23 = smov 256   ;;  %s1082_s29 = smov 128  }
  0x38   : > { %s1083_s28 = smov 8   ;;  %p739_p6 = scmp.ge.s32.totalorder %s1078_s22, 1 }
  0x39   : > { %819 = dma.hbm_to_vmem [thread:$0]  (!%p1221_p4), %s1217_s27, 512, %s1212_s6, %s1225_s15, %s1081_s23, %s1082_s29, %s1083_s28  }
  0x3a   : > { %p171_p9 = scmp.lt.s32.totalorder %s1078_s22, 5 }
  0x3c   : > { %p172_p13 = pnand %p739_p6, %p171_p9 }
  0x3d   : > { %s177_s5 = sand.u32 (!%p172_p13), 1, %s1054_s16  }
  0x3e   : > { %175 = sbr.rel (%p172_p13) target bundleno = 729 (0x2d9), region = 32  ;;  %s740_s11 = sshll.u32 (!%p172_p13), %s177_s5, 5 }
  0x3f   : > { %s178_s30 = scalar_lea.sflag (!%p172_p13), [#allocation5], %s177_s5  ;;  %s181_s25 = scalar_lea.vmem (!%p172_p13), [#allocation4], %s740_s11 }
  0x45   : > { %1029 = dma.done.wait (%p1184_p7), %s178_s30, 512  }
  0x46   : > { %1031 = vsyncadd (%p1184_p7), %s178_s30, 4294966784  ;;  %s201_s26 = sand.u32 1, %s1042_s13   ;;  %p741_p12 = scmp.ne.s32.totalorder %s1062_s18, 0 }
  0x47   : > { %s1263_s6 = scalar_lea.vmem [#allocation7], %s201_s26  ;;  %v1084_v0 = vmov (!%p741_p12), 0.0   ;;  %v1085_v1 = vmov (!%p741_p12), -inf  }
  0x48   : > { %206 = sbr.rel (%p741_p12) target bundleno = 79 (0x4f), region = 40  ;;  %207 = vst [vmem:[#allocation2] sm:$0xff] (!%p741_p12), %v1084_v0  ;;  %208 = vst [vmem:[#allocation2 + $0x8] sm:$0xff] (!%p741_p12), %v1084_v0 }
  0x49   : > { %209 = vst [vmem:[#allocation2 + $0x10] sm:$0xff] (!%p741_p12), %v1084_v0  ;;  %210 = vst [vmem:[#allocation2 + $0x18] sm:$0xff] (!%p741_p12), %v1084_v0 }
  0x4a   : > { %211 = vst [vmem:[#allocation3] sm:$0xff] (!%p741_p12), %v1085_v1  ;;  %212 = vst [vmem:[#allocation3 + $0x8] sm:$0xff] (!%p741_p12), %v1085_v1 }
  0x4b   : > { %213 = vst [vmem:[#allocation3 + $0x10] sm:$0xff] (!%p741_p12), %v1085_v1  ;;  %214 = vst [vmem:[#allocation3 + $0x18] sm:$0xff] (!%p741_p12), %v1085_v1 }
  0x4f PF: > { %v215_v2 = vld [vmem:[%s181_s25] sm:$0xff]  ;;  %v216_v4 = vld [vmem:[%s181_s25 + $0x8] sm:$0xff]  ;;  %v217_v7 = vld [vmem:[%s181_s25 + $0x10] sm:$0xff]  ;;  %p742_p7 = scmp.ne.s32.totalorder %s1062_s18, 1 }
  0x50   : > { %v219_v3 = vld [vmem:[#allocation2] sm:$0xff]  ;;  %v220_v6 = vld [vmem:[#allocation2 + $0x8] sm:$0xff]  ;;  %v221_v8 = vld [vmem:[#allocation2 + $0x10] sm:$0xff]  ;;  %v1086_v33 = vmov (!%p742_p7), 0.0|0.0   ;;  %vm1087_vm0 = vmmov (!%p742_p7), 0   ;;  %v1088_v37 = vmov (!%p742_p7), 0.0   ;;  %v284_v38 = vlaneseq (!%p742_p7) }
  0x51   : > { %v223_v5 = vadd.f32 %v219_v3, %v215_v2  ;;  %v224_v9 = vadd.f32 %v220_v6, %v216_v4  ;;  %v225_v10 = vadd.f32 %v221_v8, %v217_v7  ;;  %v218_v11 = vld [vmem:[%s181_s25 + $0x18] sm:$0xff]  ;;  %v231_v13 = vld [vmem:[#allocation3] sm:$0xff]  ;;  %v232_v16 = vld [vmem:[#allocation3 + $0x8] sm:$0xff]  ;;  %246 = sbr.rel (%p742_p7) target bundleno = 704 (0x2c0), region = 44  ;;  %799 = vmatprep.subr.bf16.mxu0 (!%p742_p7), %v1086_v33  ;;  %805 = vmatprep.subr.bf16.mxu1 (!%p742_p7), %v1086_v33  ;;  %vm295_vm1 = vcmask (!%p742_p7), 130112  }
  0x52   : > { %v222_v12 = vld [vmem:[#allocation2 + $0x18] sm:$0xff]  ;;  %v235_v15 = vmax.f32 %v231_v13, %v215_v2  ;;  %v233_v17 = vld [vmem:[#allocation3 + $0x10] sm:$0xff]  ;;  %v236_v19 = vmax.f32 %v232_v16, %v216_v4  ;;  %v275_v30 = vld [vmem:[%s1355_s1] sm:$0xff] (!%p742_p7)  ;;  %775 = vmatprep.mubr.msk.f32.mxu0 (!%p742_p7), %vm1087_vm0, %v1088_v37  ;;  %786 = vmatprep.mubr.msk.f32.mxu1 (!%p742_p7), %vm1087_vm0, %v1088_v37  ;;  %v285_v39 = vand.u32 (!%p742_p7), 127, %v284_v38  ;;  %v287_v40 = vshrl.u32 (!%p742_p7), %v284_v38, 7 }
  0x53   : > { %227 = vst [vmem:[#allocation2] sm:$0xff] %v223_v5  ;;  %v226_v14 = vadd.f32 %v222_v12, %v218_v11  ;;  %v234_v18 = vld [vmem:[#allocation3 + $0x18] sm:$0xff]  ;;  %228 = vst [vmem:[#allocation2 + $0x8] sm:$0xff] %v224_v9  ;;  %v237_v20 = vmax.f32 %v233_v17, %v217_v7  ;;  %v276_v31 = vld [vmem:[%s1355_s1 + $0x8] sm:$0xff] (!%p742_p7)  ;;  %vm302_vm2 = vcmask (!%p742_p7), 195712   ;;  %vm309_vm3 = vcmask (!%p742_p7), 261312  }
  0x54   : > { %229 = vst [vmem:[#allocation2 + $0x10] sm:$0xff] %v225_v10  ;;  %v238_v21 = vmax.f32 %v234_v18, %v218_v11  ;;  %239 = vst [vmem:[#allocation3] sm:$0xff] %v235_v15  ;;  %v800_v32 = vpack.c.bf16 (!%p742_p7), %v276_v31, %v275_v30  ;;  %v277_v34 = vld [vmem:[%s1355_s1 + $0x10] sm:$0xff] (!%p742_p7)  ;;  %v278_v35 = vld [vmem:[%s1355_s1 + $0x18] sm:$0xff] (!%p742_p7)  ;;  %v304_v41 = vadd.s32 (!%p742_p7), 4294967272, %v285_v39  ;;  %v290_v42 = vadd.s32 (!%p742_p7), 4294967288, %v285_v39 }
  0x55   : > { %230 = vst [vmem:[#allocation2 + $0x18] sm:$0xff] %v226_v14  ;;  %240 = vst [vmem:[#allocation3 + $0x8] sm:$0xff] %v236_v19  ;;  %v803_v36 = vpack.c.bf16 (!%p742_p7), %v278_v35, %v277_v34  ;;  %v297_v43 = vadd.s32 (!%p742_p7), 4294967280, %v285_v39  ;;  %v288_v46 = vsub.s32 (!%p742_p7), %v285_v39, %v287_v40  ;;  %vm311_vm4 = vcmask (!%p742_p7), 261120   ;;  %v279_v10 = vld [vmem:[%s1356_s2] sm:$0x3] (!%p742_p7) }
  0x56   : > { %241 = vst [vmem:[#allocation3 + $0x10] sm:$0xff] %v237_v20  ;;  %242 = vst [vmem:[#allocation3 + $0x18] sm:$0xff] %v238_v21  ;;  %801 = vmatpush3.bf16.msra.mxu0 (!%p742_p7), %v800_v32  ;;  %807 = vmatpush3.bf16.msra.mxu1 (!%p742_p7), %v800_v32  ;;  %v307_v48 = vsub.s32 (!%p742_p7), %v304_v41, %v287_v40  ;;  %v293_v49 = vsub.s32 (!%p742_p7), %v290_v42, %v287_v40  ;;  %vm485_vm5 = vcmask (!%p742_p7), 1041408   ;;  %vm481_vm6 = vcmask (!%p742_p7), 15360  }
  0x57   : > { %802 = vmatprep.subr.bf16.mxu0 (!%p742_p7), %v1086_v33  ;;  %808 = vmatprep.subr.bf16.mxu1 (!%p742_p7), %v1086_v33  ;;  %v300_v50 = vsub.s32 (!%p742_p7), %v297_v43, %v287_v40  ;;  %vm638_vm7 = vcmask (!%p742_p7), 253952  }
  0x5a   : > { %v247_v23 = vld [vmem:[#allocation2] sm:$0xff]  ;;  %v248_v25 = vld [vmem:[#allocation2 + $0x8] sm:$0xff]  ;;  %804 = vmatpush3.bf16.msra.mxu0 %v803_v36  ;;  %810 = vmatpush3.bf16.msra.mxu1 %v803_v36 }
  0x5b   : > { %v249_v22 = vld [vmem:[#allocation2 + $0x10] sm:$0xff]  ;;  %251 = vadd.xlane.f32.xlu0 %v247_v23  ;;  %v263_v27 = vld [vmem:[#allocation3] sm:$0xff]  ;;  %794 = vmatprep.subr.mxu0 %v1088_v37 }
  0x5c   : > { %255 = vadd.xlane.f32.xlu1 %v249_v22  ;;  %v250_v24 = vld [vmem:[#allocation2 + $0x18] sm:$0xff]  ;;  %v264_v26 = vld [vmem:[#allocation3 + $0x8] sm:$0xff]  ;;  %789 = vmatprep.subr.mxu1 %v1088_v37 }
  0x5d   : > { %v265_v28 = vld [vmem:[#allocation3 + $0x10] sm:$0xff]  ;;  %v266_v29 = vld [vmem:[#allocation3 + $0x18] sm:$0xff] }
  0x5f   : > { %253 = vadd.xlane.f32.xlu0 %v248_v25 }
  0x60   : > { %257 = vadd.xlane.f32.xlu1 %v250_v24 }
  0x63   : > { %267 = vmax.xlane.f32.xlu0 %v263_v27 }
  0x64   : > { %269 = vmax.xlane.f32.xlu1 %v264_v26 }
  0x67   : > { %271 = vmax.xlane.f32.xlu0 %v265_v28 }
  0x68   : > { %273 = vmax.xlane.f32.xlu1 %v266_v29 }
  0xe8   : > { %v252_v45 = vpop.xlane.xlu0 %251 }
  0xe9   : > { %v256_v44 = vpop.xlane.xlu1 %255  ;;  %v259_v47 = vmul.f32 0.00390625, %v252_v45 }
  0xea   : > { %v261_v51 = vmul.f32 0.00390625, %v256_v44 }
  0xeb   : > { %v289_v56 = vrot.slane %v259_v47, %v288_v46 }
  0xec   : > { %v254_v53 = vpop.xlane.xlu0 %253  ;;  %v301_v59 = vrot.slane %v261_v51, %v300_v50 }
  0xed   : > { %v258_v52 = vpop.xlane.xlu1 %257  ;;  %v260_v55 = vmul.f32 0.00390625, %v254_v53 }
  0xee   : > { %v262_v54 = vmul.f32 0.00390625, %v258_v52 }
  0xef   : > { %v294_v58 = vrot.slane %v260_v55, %v293_v49 }
  0xf0   : > { %v308_v57 = vrot.slane %v262_v54, %v307_v48  ;;  %v268_v61 = vpop.xlane.xlu0 %267 }
  0xf1   : > { %v270_v60 = vpop.xlane.xlu1 %269  ;;  %v296_v62 = vsel %vm295_vm1, %v294_v58, %v289_v56  ;;  %v392_v0 = vrot.slane %v268_v61, %v288_v46 }
  0xf2   : > { %v396_v63 = vrot.slane %v270_v60, %v293_v49  ;;  %v303_v1 = vsel %vm302_vm2, %v301_v59, %v296_v62 }
  0xf3   : > { %v310_v2 = vsel %vm309_vm3, %v308_v57, %v303_v1 }
  0xf4   : > { %776 = vmatmul.mubr.msk.f32.vlgmr.msra.gmra.mrb[0].mxu0 %vm311_vm4, %v310_v2  ;;  %v272_v3 = vpop.xlane.xlu0 %271  ;;  %v397_v7 = vsel %vm295_vm1, %v396_v63, %v392_v0 }
  0xf5   : > { %v274_v4 = vpop.xlane.xlu1 %273  ;;  %v401_v5 = vrot.slane %v272_v3, %v300_v50  ;;  %796 = vmatprep.mubr.msk.f32.mxu0 %vm1087_vm0, %v1088_v37  ;;  %795 = vmatpush3.msk.msra.mxu0 %vm485_vm5, %v279_v10 }
  0xf6   : > { %v406_v6 = vrot.slane %v274_v4, %v307_v48 }
  0xf7   : > { %v402_v8 = vsel %vm302_vm2, %v401_v5, %v397_v7 }
  0xf8   : > { %v407_v9 = vsel %vm309_vm3, %v406_v6, %v402_v8 }
  0xf9   : > { %787 = vmatmul.mubr.msk.f32.vlgmr.msra.gmra.mrb[0].mxu1 %vm311_vm4, %v407_v9 }
  0xfa   : > { %791 = vmatprep.mubr.msk.f32.mxu1 %vm1087_vm0, %v1088_v37  ;;  %790 = vmatpush3.msk.msra.mxu1 %vm485_vm5, %v279_v10 }
 0x1c7   : > { %v380_v11 = vpop.f32.mrb[0].mxu0 }
 0x1c8   : > { %v384_v12 = vmax.f32 %v380_v11, 0.0  ;;  %v777_v13 = vpop.f32.mrb[1].mxu0 }
 0x1ca   : > { %797 = vmatmul.mubr.msk.f32.vlgmr.msra.gmra.mrb[2].mxu0 %vm481_vm6, %v384_v12 }
 0x1cc   : > { %v476_v14 = vpop.f32.mrb[0].mxu1 }
 0x1cd   : > { %v480_v15 = vmax.f32 %v476_v14, 0.0  ;;  %v788_v16 = vpop.f32.mrb[1].mxu1 }
 0x1cf   : > { %792 = vmatmul.mubr.msk.f32.vlgmr.msra.gmra.mrb[2].mxu1 %vm481_vm6, %v480_v15 }
 0x29d   : > { %v628_v17 = vpop.f32.mrb[2].mxu0 }
 0x29e   : > { %v798_v18 = vpop.f32.mrb[3].mxu0 }
 0x2a2   : > { %v555_v19 = vpop.f32.mrb[2].mxu1 }
 0x2a3   : > { %v629_v20 = vadd.f32 %v628_v17, %v555_v19  ;;  %v793_v21 = vpop.f32.mrb[3].mxu1 }
 0x2a5   : > { %v749_v22 = vmul.f32 -1.442695, %v629_v20 }
 0x2a7   : > { %922 = vpow2.f32 %v749_v22 }
 0x2b1   : > { %v923_v23 = vpop.eup %922 }
 0x2b2   : > { %v635_v24 = vadd.f32 1.0, %v923_v23 }
 0x2b4   : > { %924 = vrcp.f32 %v635_v24 }
 0x2be   : > { %v925_v25 = vpop.eup %924 }
 0x2bf   : > { %639 = vst.msk [vmem:[%s1263_s6] sm:$0x1] %vm638_vm7, %v925_v25 }
 0x2c0 PF: > { %s750_s30 = sshll.u32 %s1066_s19, 4  ;;  %s653_s18 = sshll.u32 %s1263_s6, 4  ;;  %s654_s18 = int_to_ptr.vmem [resolvable:$true] %s653_s18 }
 0x2c1   : > { %s1295_s27 = scalar_lea.hbm %s1357_s3, %s750_s30  ;;  %s641_s24 = scalar_lea.sflag [#allocation6], %s201_s26 }
 0x2c2   : > { %s956_s15 = scalar_lea.vmem %s654_s18, 16  ;;  %p1368_p4 = scmp.ne.s32.totalorder %s1365_s7, 0 }
 0x2c3   : > { %p957_p2 = scmp.ne.s32.totalorder %s654_s18, %s956_s15  ;;  %s1089_s23 = smov [#allocation7]  }
 0x2c4   : > { %s960_s29 = sshll.u32 %s1089_s23, 4  ;;  %s961_s29 = int_to_ptr.vmem [resolvable:$false] %s960_s29 }
 0x2c5   : > { %p958_p0 = pnand %p957_p2, %p1368_p4  ;;  %s962_s28 = scalar_lea.vmem %s961_s29, 32 }
 0x2c6   : > { %p963_p5 = scmp.lt.s32.totalorder %s654_s18, %s961_s29  ;;  %p964_p8 = scmp.lt.s32.totalorder %s962_s28, %s956_s15 }
 0x2c7   : > { %p959_p1 = pneg %p958_p0 }
 0x2c8   : > { %p965_p3 = por %p964_p8, %p963_p5 }
 0x2ca   : > { %p966_p10 = pnand %p965_p3, %p959_p1 }
 0x2cc   : > { %969 = shalt.err (!%p966_p10)
}
 0x2cd   : > { %s970_s19 = scalar_lea.hbm %s1295_s27, 16  ;;  %s974_s5 = scalar_lea.hbm %s1357_s3, 32 }
 0x2ce   : > { %p971_p11 = scmp.ne.s32.totalorder %s1295_s27, %s970_s19  ;;  %p975_p13 = scmp.lt.u32.totalorder %s1295_s27, %s1357_s3 }
 0x2cf   : > { %p976_p12 = scmp.lt.u32.totalorder %s974_s5, %s970_s19  ;;  %p978_p2 = scmp.lt.u32.totalorder %s970_s19, %s1295_s27 }
 0x2d0   : > { %p972_p6 = pnand %p971_p11, %p1368_p4 }
 0x2d1   : > { %p977_p7 = por %p976_p12, %p975_p13 }
 0x2d2   : > { %p973_p9 = pneg %p972_p6 }
 0x2d3   : > { %p979_p0 = por %p978_p2, %p977_p7 }
 0x2d5   : > { %p980_p1 = pnand %p979_p0, %p973_p9 }
 0x2d7   : > { %983 = shalt.err (!%p980_p1)
}
 0x2d8   : > { %814 = dma.vmem_to_hbm [thread:$0]  (%p1368_p4), %s654_s18, 16, %s1295_s27, %s641_s24  }
 0x2d9 PF: > { %p825_p5 = scmp.ge.s32.totalorder %s1078_s22, 2  ;;  %s665_s25 = sand.u32 1, %s1038_s12  }
 0x2da   : > { %p1369_p8 = scmp.ne.s32.totalorder %s1366_s10, 0  ;;  %s666_s4 = scalar_lea.sflag [#allocation6], %s665_s25 }
 0x2dc   : > { %p821_p3 = pnand %p825_p5, %p1369_p8 }
 0x2de   : > { %1033 = dma.done.wait (!%p821_p3), %s666_s4, 16  }
 0x2df   : > { %1035 = vsyncadd (!%p821_p3), %s666_s4, 4294967280  ;;  %s19_s22 = sadd.s32 1, %s1078_s22   ;;  %s1370_s7 = sld [smem:[#allocation10_spill]] }
 0x2e0   : > { %p16_p10 = scmp.ge.s32.totalorder %s19_s22, 6   ;;  %s1371_s27 = sld [smem:[#allocation11_spill]] }
 0x2e1   : > { %s1372_s12 = smov %s1042_s13  ;;  %s1373_s13 = smov %s1046_s14 }
 0x2e2   : > { %s1374_s14 = smov %s1197_s8  ;;  %s1375_s15 = smov %s1054_s16 }
 0x2e3   : > { %s1376_s16 = smov %s1058_s17  ;;  %s1377_s17 = smov %s1200_s9 }
 0x2e4   : > { %s1378_s18 = smov %s1070_s20  ;;  %s1379_s19 = smov %s1074_s21 }
 0x2e5   : > { %s1380_s20 = smov %s1370_s7  ;;  %18 = sbr.rel (!%p16_p10) target bundleno = 9 (0x9), region = 85 }
 0x2e6   : > { %s1381_s21 = smov %s1371_s27 }
 0x2ec   :  { %670 = vsyncpa [#allocation5], 1 }
 0x2ed   :  { %672 = vsyncpa [#allocation5 + $0x1], 1 }
 0x2ee   :  { %673 = vsyncpa [#allocation6], 1 }
 0x2ef   :  { %675 = vsyncpa [#allocation6 + $0x1], 1 }

</bundles_post_ra>
